<compile_context>
chip_gen: v6e
topology: v6e:2x2x1
jax: 0.10.0
libtpu: 0.0.40
codegen_flags: <defaults>
</compile_context>

<pallas_src>
import math

import jax
import jax.numpy as jnp
from jax.experimental import pallas as pl
from jax.experimental.pallas import tpu as pltpu

_LANES = 128


def _round_up(x, m):
    return (x + m - 1) // m * m


def _make_gating_kernel(G, H):
    """Kernel over a (TM, G*H) tile; each 128-lane row holds G logical rows."""
    W = G * H

    if G == 1:
        def kernel(img_ref, txt_ref, out_ref):
            img = img_ref[...]                    # (TM, H)
            txt = txt_ref[...]
            # exact f32 accumulation of the per-row dot (lane reduce on XLU)
            dot = jnp.sum(img * txt, axis=-1, keepdims=True, dtype=jnp.float32)
            gate = jax.nn.sigmoid(dot).astype(img.dtype)   # EUP, free slot
            out_ref[...] = (gate * txt + img).astype(out_ref.dtype)
        return kernel

    def kernel(img_ref, txt_ref, out_ref):
        img = img_ref[...]                        # (TM, W), lane-dense
        txt = txt_ref[...]
        prod = img * txt
        # Block-diagonal ones matrix: seg_ones[a, b] = 1 iff lanes a and b
        # belong to the same H-wide segment.  Built from iota each step
        # (W*W elements, negligible vs the TM*W block) to avoid an extra
        # input stream.  The matmul does the segmented reduce AND the
        # broadcast back across the segment in one MXU op (vector-extended
        # slot), keeping the VPU/XLU off the critical path.
        ra = jax.lax.broadcasted_iota(jnp.int32, (W, W), 0) // H
        rb = jax.lax.broadcasted_iota(jnp.int32, (W, W), 1) // H
        seg_ones = (ra == rb).astype(prod.dtype)
        dot_full = jnp.dot(prod, seg_ones,
                           preferred_element_type=jnp.float32,
                           precision=jax.lax.Precision.HIGHEST)
        gate = jax.nn.sigmoid(dot_full).astype(img.dtype)   # EUP, free slot
        out_ref[...] = (gate * txt + img).astype(out_ref.dtype)
    return kernel


def cross_modal_gating(image_proj, interactive_text_features, *,
                       target_block_bytes=4 * 1024 * 1024):
    assert image_proj.shape == interactive_text_features.shape
    assert image_proj.dtype == interactive_text_features.dtype
    orig_shape = image_proj.shape
    H = orig_shape[-1]
    n_rows = math.prod(orig_shape[:-1]) if len(orig_shape) > 1 else 1
    dtype = image_proj.dtype
    itemsize = jnp.dtype(dtype).itemsize

    # Lane packing: pack G = 128 // H consecutive rows into one 128-lane row
    # when that is an exact, copy-free reshape (n_rows divisible by G) and we
    # have at least a sublane-pack worth of packed rows.  Otherwise fall back
    # to G=1 (still zero-copy; partial-lane blocks are handled by masking).
    # TODO(synk): generalize packing to H not dividing 128 (e.g. 96/192) via
    # G = lcm(H,128)//H once the tail/MXU-cost tradeoff is tuned.
    G = 1
    if H < _LANES and _LANES % H == 0:
        g = _LANES // H
        if n_rows % g == 0 and n_rows // g >= 8:
            G = g
    W = G * H
    rows = n_rows // G

    img2 = image_proj.reshape(rows, W)                     # row-major relabel, free
    txt2 = interactive_text_features.reshape(rows, W)

    # Row tile: multiple of the sublane pack (8 f32 / 16 bf16 / 32 int8),
    # sized against the 128-lane-padded VMEM footprint so narrow-H tiles
    # don't blow past the VMEM budget.
    row_align = 8 * max(1, 4 // itemsize)
    w_vmem = _round_up(W, _LANES)
    tm = (target_block_bytes // (w_vmem * itemsize)) // row_align * row_align
    tm = max(tm, row_align)
    if rows <= tm:
        tm = rows           # single block; block dims == full array dims is legal
    grid = (pl.cdiv(rows, tm),)    # no padding: boundary block is masked by Pallas

    in_spec = pl.BlockSpec((tm, W), lambda i: (i, 0))
    out = pl.pallas_call(
        _make_gating_kernel(G, H),
        out_shape=jax.ShapeDtypeStruct((rows, W), dtype),
        grid_spec=pltpu.PrefetchScalarGridSpec(
            num_scalar_prefetch=0,
            grid=grid,
            in_specs=[in_spec, in_spec],
            out_specs=pl.BlockSpec((tm, W), lambda i: (i, 0)),
        ),
        compiler_params=pltpu.CompilerParams(
            dimension_semantics=("parallel",),       # shard rows across v7x TCs
            vmem_limit_bytes=48 * 1024 * 1024,       # 6 x 4MiB bufs + intermediates, fits v7x
        ),
    )(img2, txt2)

    return out.reshape(orig_shape)


def cross_modal_gating_ref(image_proj, text):
    gate = jax.nn.sigmoid(jnp.sum(image_proj * text, axis=-1))
    return gate[..., None] * text + image_proj


if __name__ == "__main__":
    # CrossModalGating(hidden_dim) has no learnable parameters (only a Sigmoid),
    # so nothing to initialize beyond the example inputs.
    key = jax.random.PRNGKey(0)
    k1, k2, k3, k4, k5, k6 = jax.random.split(key, 6)

    # 1) Shapes the module implies: (batch=2, seq=8, hidden=32).
    B, S, H = 2, 8, 32
    image_proj = jax.random.normal(k1, (B, S, H), dtype=jnp.float32)
    text_feats = jax.random.normal(k2, (B, S, H), dtype=jnp.float32)
    out = jax.block_until_ready(cross_modal_gating(image_proj, text_feats))
    ref = cross_modal_gating_ref(image_proj, text_feats)
    assert out.shape == (B, S, H)
    assert jnp.allclose(out, ref, atol=1e-5, rtol=1e-5)

    # 2) Lane-packed path with a multi-step grid and a masked partial last block
    #    (small target_block_bytes forces tm=16 on 18 packed rows).
    a = jax.random.normal(k3, (2, 36, 32), dtype=jnp.float32)
    b = jax.random.normal(k4, (2, 36, 32), dtype=jnp.float32)
    out2 = jax.block_until_ready(
        cross_modal_gating(a, b, target_block_bytes=8 * 1024))
    assert jnp.allclose(out2, cross_modal_gating_ref(a, b), atol=1e-5, rtol=1e-5)

    # 3) Unpacked (G=1) path: H does not divide 128.
    c = jax.random.normal(k5, (3, 5, 96), dtype=jnp.float32)
    d = jax.random.normal(k6, (3, 5, 96), dtype=jnp.float32)
    out3 = jax.block_until_ready(cross_modal_gating(c, d))
    assert jnp.allclose(out3, cross_modal_gating_ref(c, d), atol=1e-5, rtol=1e-5)

    print("KERNEL_OK")
</pallas_src>

<mosaic_0001>
module attributes {stable_mosaic.version = 11 : i64} {
  func.func @kernel(%arg0: i32, %arg1: memref<16x32xf32, #tpu.memory_space<vmem>>, %arg2: memref<16x32xf32, #tpu.memory_space<vmem>>, %arg3: memref<16x32xf32, #tpu.memory_space<vmem>>) attributes {dimension_semantics = [#tpu.dimension_semantics<parallel>], iteration_bounds = array<i64: 1>, scalar_prefetch = 0 : i64, scratch_operands = 0 : i64, tpu.core_type = #tpu.core_type<tc>, window_params = [{transform_indices = @transform_0, window_bounds = array<i64: 16, 32>}, {transform_indices = @transform_1, window_bounds = array<i64: 16, 32>}, {transform_indices = @transform_2, window_bounds = array<i64: 16, 32>}]} {
    %c0 = arith.constant 0 : index
    %c0_0 = arith.constant 0 : index
    %0 = vector.load %arg1[%c0, %c0_0] : memref<16x32xf32, #tpu.memory_space<vmem>>, vector<16x32xf32>
    %c0_1 = arith.constant 0 : index
    %c0_2 = arith.constant 0 : index
    %1 = vector.load %arg2[%c0_1, %c0_2] : memref<16x32xf32, #tpu.memory_space<vmem>>, vector<16x32xf32>
    %2 = arith.mulf %0, %1 : vector<16x32xf32>
    %cst = arith.constant dense<0.000000e+00> : vector<16xf32>
    %3 = vector.multi_reduction <add>, %2, %cst [1] : vector<16x32xf32> to vector<16xf32>
    %4 = vector.shape_cast %3 : vector<16xf32> to vector<16x1xf32>
    %5 = arith.negf %4 : vector<16x1xf32>
    %6 = math.exp %5 : vector<16x1xf32>
    %cst_3 = arith.constant 1.000000e+00 : f32
    %7 = vector.broadcast %cst_3 : f32 to vector<16x1xf32>
    %8 = arith.addf %7, %6 : vector<16x1xf32>
    %9 = arith.divf %7, %8 : vector<16x1xf32>
    %10 = vector.broadcast %9 : vector<16x1xf32> to vector<16x32xf32>
    %11 = arith.mulf %10, %1 : vector<16x32xf32>
    %12 = arith.addf %11, %0 : vector<16x32xf32>
    %c0_4 = arith.constant 0 : index
    %c0_5 = arith.constant 0 : index
    %13 = vector.load %arg3[%c0_4, %c0_5] : memref<16x32xf32, #tpu.memory_space<vmem>>, vector<16x32xf32>
    tpu.vector_store %arg3[%c0_4, %c0_5], %12 {strides = array<i32>} : memref<16x32xf32, #tpu.memory_space<vmem>>, vector<16x32xf32>,
    return
  }
  func.func @transform_0(%arg0: i32) -> (i32, i32) {
    %c0_i32 = arith.constant 0 : i32
    %c0_i32_0 = arith.constant 0 : i32
    return %arg0, %c0_i32 : i32, i32
  }
  func.func @transform_1(%arg0: i32) -> (i32, i32) {
    %c0_i32 = arith.constant 0 : i32
    %c0_i32_0 = arith.constant 0 : i32
    return %arg0, %c0_i32 : i32, i32
  }
  func.func @transform_2(%arg0: i32) -> (i32, i32) {
    %c0_i32 = arith.constant 0 : i32
    %c0_i32_0 = arith.constant 0 : i32
    return %arg0, %c0_i32 : i32, i32
  }
}

</mosaic_0001>

<bundles_post_ra>
// kernel: tpu_custom_call.1
= control target key start
LH: loop header
LB: loop body
LE: loop exit
PB: predicated region body
PF: predicated region fallthrough
CT: control target
= control target key end

     0   :  { %7 = vsyncpa [#allocation3], 0  ;;  %s212_s0 = inlined_call_operand.hbm [shape: f32[16,32], index: 0, kind: input, shape index: {}]   ;;  %s213_s1 = inlined_call_operand.hbm [shape: f32[16,32], index: 1, kind: input, shape index: {}]   ;;  %s214_s2 = inlined_call_operand.hbm [shape: f32[16,32], index: 2, kind: output, shape index: {}]  }
   0x1   :  { %8 = vsyncpa [#allocation6], 0 }
   0x2   :  { %9 = vsyncpa [#allocation4], 0  ;;  %s170_s9 = smov [#allocation2]  }
   0x3   :  { %s15_s10 = sshll.u32 %s170_s9, 4  ;;  %s16_s10 = int_to_ptr.vmem [resolvable:$true] %s15_s10 }
   0x4   :  { %s112_s11 = scalar_lea.vmem %s16_s10, 256  ;;  %p117_p1 = scmp.lt.s32.totalorder %s16_s10, %s16_s10 }
   0x5   :  { %p113_p0 = scmp.ne.s32.totalorder %s16_s10, %s112_s11  ;;  %p118_p2 = scmp.lt.s32.totalorder %s112_s11, %s112_s11 }
   0x7   :  { %p119_p3 = por %p118_p2, %p117_p1 }
   0x9   :  { %p120_p4 = pnand %p119_p3, %p113_p0 }
   0xb   :  { %123 = shalt.err (!%p120_p4)
}
   0xc   :  { %s171_s12 = smov 128   ;;  %s172_s13 = smov 8  }
   0xd   :  { %21 = dma.hbm_to_vmem [thread:$0]  %s212_s0, 256, %s16_s10, [#allocation3], %s171_s12, %s171_s12, %s172_s13  }
   0xe   :  { %s173_s16 = smov [#allocation5]  }
   0xf   :  { %s27_s17 = sshll.u32 %s173_s16, 4  ;;  %s28_s17 = int_to_ptr.vmem [resolvable:$true] %s27_s17 }
  0x10   :  { %s132_s18 = scalar_lea.vmem %s28_s17, 256  ;;  %p137_p6 = scmp.lt.s32.totalorder %s28_s17, %s28_s17 }
  0x11   :  { %p133_p5 = scmp.ne.s32.totalorder %s28_s17, %s132_s18  ;;  %p138_p7 = scmp.lt.s32.totalorder %s132_s18, %s132_s18 }
  0x13   :  { %p139_p8 = por %p138_p7, %p137_p6 }
  0x15   :  { %p140_p9 = pnand %p139_p8, %p133_p5 }
  0x17   :  { %143 = shalt.err (!%p140_p9)
}
  0x18   :  { %33 = dma.hbm_to_vmem [thread:$0]  %s213_s1, 256, %s28_s17, [#allocation6], %s171_s12, %s171_s12, %s172_s13  }
  0x19   :  { %164 = dma.done.wait [#allocation3], 256  }
  0x1a   :  { %165 = vsyncadd [#allocation3], 4294967040 }
  0x1b   :  { %166 = dma.done.wait [#allocation6], 256  }
  0x1c   :  { %167 = vsyncadd [#allocation6], 4294967040  ;;  %v40_v0 = vld [vmem:[#allocation2] sm:$0xff]  ;;  %v42_v1 = vld [vmem:[#allocation5] sm:$0xff]  ;;  %vm46_vm0 = vcmask 261120   ;;  %s174_s0 = smov [#allocation7]  }
  0x1d   :  { %v41_v2 = vld [vmem:[#allocation2 + $0x8] sm:$0xff]  ;;  %v44_v3 = vmul.f32 %v42_v1, %v40_v0  ;;  %v43_v4 = vld [vmem:[#allocation5 + $0x8] sm:$0xff]  ;;  %s76_s1 = sshll.u32 %s174_s0, 4  ;;  %s77_s1 = int_to_ptr.vmem [resolvable:$true] %s76_s1 }
  0x1e   :  { %v45_v5 = vmul.f32 %v43_v4, %v41_v2  ;;  %s144_s21 = scalar_lea.vmem %s77_s1, 256  ;;  %p149_p11 = scmp.lt.s32.totalorder %s77_s1, %s77_s1 }
  0x1f   :  { %v47_v6 = vsel %vm46_vm0, %v44_v3, 0.0  ;;  %p145_p10 = scmp.ne.s32.totalorder %s77_s1, %s144_s21  ;;  %p150_p12 = scmp.lt.s32.totalorder %s144_s21, %s144_s21 }
  0x20   :  { %48 = vadd.xlane.f32.xlu0 %v47_v6  ;;  %v50_v7 = vsel %vm46_vm0, %v45_v5, 0.0 }
  0x21   :  { %p151_p13 = por %p150_p12, %p149_p11 }
  0x23   :  { %p152_p0 = pnand %p151_p13, %p145_p10 }
  0x24   :  { %51 = vadd.xlane.f32.xlu0 %v50_v7 }
  0xa9   :  { %v49_v8 = vpop.xlane.xlu0 %48 }
  0xaa   :  { %v89_v9 = vmul.f32 -1.442695, %v49_v8 }
  0xac   :  { %96 = vpow2.f32 %v89_v9 }
  0xad   :  { %v52_v10 = vpop.xlane.xlu0 %51 }
  0xae   :  { %v90_v11 = vmul.f32 -1.442695, %v52_v10 }
  0xb0   :  { %98 = vpow2.f32 %v90_v11 }
  0xb9   :  { %v97_v12 = vpop.eup %96 }
  0xba   :  { %v59_v13 = vadd.f32 1.0, %v97_v12 }
  0xbc   :  { %100 = vrcp.f32 %v59_v13 }
  0xbd   :  { %v99_v14 = vpop.eup %98 }
  0xbe   :  { %v60_v15 = vadd.f32 1.0, %v99_v14 }
  0xc0   :  { %102 = vrcp.f32 %v60_v15 }
  0xc9   :  { %v101_v16 = vpop.eup %100 }
  0xca   :  { %v65_v17 = vmul.f32 %v101_v16, %v42_v1 }
  0xcc   :  { %v67_v18 = vadd.f32 %v65_v17, %v40_v0 }
  0xcd   :  { %v103_v19 = vpop.eup %102 }
  0xce   :  { %v66_v20 = vmul.f32 %v103_v19, %v43_v4  ;;  %69 = vst.msk [vmem:[#allocation7] sm:$0xff] %vm46_vm0, %v67_v18 }
  0xd0   :  { %v68_v21 = vadd.f32 %v66_v20, %v41_v2 }
  0xd2   :  { %70 = vst.msk [vmem:[#allocation7 + $0x8] sm:$0xff] %vm46_vm0, %v68_v21 }
  0xd3   :  { %155 = shalt.err (!%p152_p0)
}
  0xd4   :  { %82 = dma.vmem_to_hbm [thread:$0]  %s77_s1, 256, %s214_s2, [#allocation4], %s171_s12, %s171_s12, %s172_s13  }
  0xd5   :  { %168 = dma.done.wait [#allocation4], 256  }
  0xd6   :  { %169 = vsyncadd [#allocation4], 4294967040 }
  0xd7   :  { %86 = vsyncpa [#allocation3], 1 }
  0xd8   :  { %87 = vsyncpa [#allocation6], 1 }
  0xd9   :  { %88 = vsyncpa [#allocation4], 1 }

</bundles_post_ra>
